<compile_context>
chip_gen: v6e
topology: v6e:2x2x1
jax: 0.10.0
libtpu: 0.0.40
codegen_flags: <defaults>
</compile_context>

<pallas_src>
import math

import jax
import jax.numpy as jnp
from jax import lax
from jax.experimental import pallas as pl
from jax.experimental.pallas import tpu as pltpu

_INV_SQRT2 = 1.0 / math.sqrt(2.0)
_LN_EPS = 1e-5  # matches nn.LayerNorm default


def _gelu_exact_f32(h):
    # Exact erf GELU (PyTorch F.gelu default), computed in f32.
    return 0.5 * h * (1.0 + lax.erf(h * _INV_SQRT2))


def _layer_norm_f32(y, gamma_f32, beta_f32):
    mean = jnp.mean(y, axis=-1, keepdims=True)
    centered = y - mean
    var = jnp.mean(centered * centered, axis=-1, keepdims=True)
    return centered * lax.rsqrt(var + _LN_EPS) * gamma_f32 + beta_f32


# ---------------------------------------------------------------------------
# Kernels
# ---------------------------------------------------------------------------
def _ffn_kernel_resident(x_ref, w1_ref, b1_ref, w2_ref, b2_ref,
                         gamma_ref, beta_ref, o_ref):
    """Fast path: full w1/w2 VMEM-resident, single (row-tile) grid axis."""
    x = x_ref[...]                                           # (tm, D)
    # Note: garbage rows in a partial tail x tile stay row-local (all ops are
    # per-row) and are discarded by the masked output store.
    h = jnp.dot(x, w1_ref[...], preferred_element_type=jnp.float32)
    h = _gelu_exact_f32(h + b1_ref[...].astype(jnp.float32))
    # dropout == identity at eval time.
    y = jnp.dot(h.astype(w2_ref.dtype), w2_ref[...],
                preferred_element_type=jnp.float32)
    y = y + b2_ref[...].astype(jnp.float32) + x.astype(jnp.float32)  # residual
    out = _layer_norm_f32(y, gamma_ref[...].astype(jnp.float32),
                          beta_ref[...].astype(jnp.float32))
    o_ref[...] = out.astype(o_ref.dtype)


def _ffn_kernel_tiled(x_ref, w1_ref, b1_ref, w2_ref, b2_ref,
                      gamma_ref, beta_ref, o_ref, acc_ref):
    """Fallback: hidden dim tiled on grid axis 1 with an f32 accumulator.

    The hidden-axis block indices are serpentined in the wrapper's index maps;
    the partial sums are commutative so init at k==0 / finalize at the last k
    of the grid remains correct regardless of visit order.
    """
    k = pl.program_id(1)

    @pl.when(k == 0)
    def _init():
        acc_ref[...] = jnp.zeros_like(acc_ref)

    x = x_ref[...]                                           # (tm, D)
    h = jnp.dot(x, w1_ref[...], preferred_element_type=jnp.float32)
    h = _gelu_exact_f32(h + b1_ref[...].astype(jnp.float32))
    acc_ref[...] += jnp.dot(h.astype(w2_ref.dtype), w2_ref[...],
                            preferred_element_type=jnp.float32)

    @pl.when(k == pl.num_programs(1) - 1)
    def _finalize():
        y = acc_ref[...] + b2_ref[...].astype(jnp.float32)
        y = y + x.astype(jnp.float32)                        # residual
        out = _layer_norm_f32(y, gamma_ref[...].astype(jnp.float32),
                              beta_ref[...].astype(jnp.float32))
        o_ref[...] = out.astype(o_ref.dtype)


# ---------------------------------------------------------------------------
# Tiling plan
# ---------------------------------------------------------------------------
def _round_up(x, m):
    return ((x + m - 1) // m) * m


def _tpu_vmem_info():
    """(vmem_capacity_bytes, has_two_tensorcores) with safe fallbacks."""
    cap = None
    try:
        cap = int(pltpu.get_tpu_info().vmem_capacity_bytes)
    except Exception:
        cap = None
    kind = ""
    try:
        kind = jax.devices()[0].device_kind.lower()
    except Exception:
        pass
    if cap is None or cap <= 0:
        cap = (64 << 20) if "v7" in kind else (128 << 20)
    two_cores = ("v7" in kind) or (cap <= (80 << 20))
    return cap, two_cores


def _plan_tiles(rows, D, H, x_itemsize, w_itemsize, cap, two_cores, *,
                row_tile=None, hidden_tile=None, force_mode=None):
    # dtype-aware sublane alignment: 8 rows for f32, 16 for bf16, 32 for int8
    align = max(8, 32 // x_itemsize)
    small_vmem = cap <= (80 << 20)                       # v7x-like (64 MiB/TC)
    headroom = (12 << 20) if small_vmem else (24 << 20)  # compiler scratch/sems
    budget = cap - headroom

    tm_target = row_tile if row_tile is not None else (512 if small_vmem else 1024)
    th_target = hidden_tile if hidden_tile is not None else (256 if small_vmem else 512)
    th_target = max(128, (int(th_target) // 128) * 128)

    rows_pad = _round_up(rows, align)
    tm = min(_round_up(int(tm_target), align), rows_pad)
    if two_cores and rows_pad > align:
        # ensure >=2 row tiles so the "parallel" axis shards across both TCs
        tm = min(tm, _round_up(-(-rows // 2), align))
    tm = max(tm, align)

    def est_resident(tm_):
        return int(1.25 * (
            2 * tm_ * D * x_itemsize          # x row tiles (double-buffered)
            + 2 * tm_ * D * x_itemsize        # out row tiles
            + 2 * D * H * w_itemsize          # w1 (counted double-buffered)
            + 2 * H * D * w_itemsize          # w2
            + 2 * 8 * H * 4                   # b1 slab, sublane-padded to 8 rows
            + 3 * 2 * 8 * D * 4               # b2 / gamma / beta slabs
            + 3 * tm_ * H * 4                 # fc1 / erf / GELU f32 temporaries
            + 2 * tm_ * D * 4                 # f32 y / LayerNorm temporaries
        )) + (4 << 20)

    def est_tiled(tm_, th_):
        return int(1.25 * (
            2 * tm_ * D * x_itemsize
            + 2 * tm_ * D * x_itemsize
            + 2 * D * th_ * w_itemsize
            + 2 * th_ * D * w_itemsize
            + 2 * 8 * th_ * 4
            + 3 * 2 * 8 * D * 4
            + 3 * tm_ * th_ * 4
            + tm_ * D * 4                     # f32 accumulator scratch
            + 2 * tm_ * D * 4
        )) + (4 << 20)

    weight_bytes = 2 * (D * H + H * D) * w_itemsize
    want_resident = (force_mode == "resident"
                     or (force_mode is None and weight_bytes <= budget // 2))
    if want_resident:
        tm_r = tm
        while tm_r > align and est_resident(tm_r) > budget:
            tm_r = max(align, _round_up(tm_r // 2, align))
        if est_resident(tm_r) <= budget or force_mode == "resident":
            return {"mode": "resident", "tm": tm_r, "th": None,
                    "est": est_resident(tm_r), "budget": budget}

    th = min(th_target, _round_up(H, 128))
    th = max(128, (th // 128) * 128)
    tm_t = tm
    while est_tiled(tm_t, th) > budget:
        if th > 128:
            th = max(128, ((th // 2) // 128) * 128)
        elif tm_t > align:
            tm_t = max(align, _round_up(tm_t // 2, align))
        else:
            break
    return {"mode": "tiled", "tm": tm_t, "th": th,
            "est": est_tiled(tm_t, th), "budget": budget}


# ---------------------------------------------------------------------------
# Wrapper
# ---------------------------------------------------------------------------
def feed_forward(x, w1, b1, w2, b2, gamma, beta, *,
                 compute_dtype=None, row_tile=None, hidden_tile=None,
                 _force_mode=None):
    """x: (..., D).  w1: (D, H), b1: (H,), w2: (H, D), b2: (D,),
    gamma/beta: (D,).  Returns an array with the same shape/dtype as x.

    compute_dtype: optional dtype (e.g. jnp.bfloat16) for the matmul operands
    (x, w1, w2).  Accumulation, bias, GELU and LayerNorm math stay f32.
    """
    orig_shape = x.shape
    orig_dtype = x.dtype
    D = orig_shape[-1]
    H = w1.shape[1]
    assert w1.shape == (D, H) and w2.shape == (H, D), "weight shapes"
    assert b1.shape == (H,) and b2.shape == (D,), "bias shapes"

    if compute_dtype is not None:
        x = x.astype(compute_dtype)
        w1 = w1.astype(compute_dtype)
        w2 = w2.astype(compute_dtype)

    x2 = x.reshape(-1, D)
    rows = x2.shape[0]
    xb = jnp.dtype(x2.dtype).itemsize
    wb = jnp.dtype(w1.dtype).itemsize

    cap, two_cores = _tpu_vmem_info()
    plan = _plan_tiles(rows, D, H, xb, wb, cap, two_cores,
                       row_tile=row_tile, hidden_tile=hidden_tile,
                       force_mode=_force_mode)
    tm = plan["tm"]
    vmem_limit = int(min(plan["budget"], max(plan["est"], 32 << 20)))

    # Biases / LN params as f32 (1, N) slabs.
    b1_2 = b1.astype(jnp.float32).reshape(1, H)
    b2_2 = b2.astype(jnp.float32).reshape(1, D)
    g_2 = gamma.astype(jnp.float32).reshape(1, D)
    be_2 = beta.astype(jnp.float32).reshape(1, D)

    if plan["mode"] == "resident":
        grid = (pl.cdiv(rows, tm),)
        out = pl.pallas_call(
            _ffn_kernel_resident,
            out_shape=jax.ShapeDtypeStruct((rows, D), orig_dtype),
            grid=grid,
            in_specs=[
                pl.BlockSpec((tm, D), lambda i: (i, 0)),   # x row tile
                pl.BlockSpec((D, H), lambda i: (0, 0)),    # w1 (resident)
                pl.BlockSpec((1, H), lambda i: (0, 0)),    # b1
                pl.BlockSpec((H, D), lambda i: (0, 0)),    # w2 (resident)
                pl.BlockSpec((1, D), lambda i: (0, 0)),    # b2
                pl.BlockSpec((1, D), lambda i: (0, 0)),    # gamma
                pl.BlockSpec((1, D), lambda i: (0, 0)),    # beta
            ],
            out_specs=pl.BlockSpec((tm, D), lambda i: (i, 0)),
            compiler_params=pltpu.CompilerParams(
                dimension_semantics=("parallel",),
                vmem_limit_bytes=vmem_limit),
        )(x2, w1, b1_2, w2, b2_2, g_2, be_2)
    else:
        th = plan["th"]
        Hp = _round_up(H, th)
        if Hp != H:
            # Zero-padded hidden units contribute GELU(0 + 0) = 0 through zero
            # w2 rows, so results are unchanged.
            w1 = jnp.pad(w1, ((0, 0), (0, Hp - H)))
            b1_2 = jnp.pad(b1_2, ((0, 0), (0, Hp - H)))
            w2 = jnp.pad(w2, ((0, Hp - H), (0, 0)))
        nk = Hp // th

        def _serp(i, k):
            # odd row tiles traverse the hidden axis backwards -> the last
            # weight tile of row tile i is the first of row tile i+1 (one
            # fewer w1+w2 DMA per row tile).
            return k + (i % 2) * (nk - 1 - 2 * k)

        grid = (pl.cdiv(rows, tm), nk)
        out = pl.pallas_call(
            _ffn_kernel_tiled,
            out_shape=jax.ShapeDtypeStruct((rows, D), orig_dtype),
            grid=grid,
            in_specs=[
                pl.BlockSpec((tm, D), lambda i, k: (i, 0)),            # x
                pl.BlockSpec((D, th), lambda i, k: (0, _serp(i, k))),  # w1 tile
                pl.BlockSpec((1, th), lambda i, k: (0, _serp(i, k))),  # b1 tile
                pl.BlockSpec((th, D), lambda i, k: (_serp(i, k), 0)),  # w2 tile
                pl.BlockSpec((1, D), lambda i, k: (0, 0)),             # b2
                pl.BlockSpec((1, D), lambda i, k: (0, 0)),             # gamma
                pl.BlockSpec((1, D), lambda i, k: (0, 0)),             # beta
            ],
            out_specs=pl.BlockSpec((tm, D), lambda i, k: (i, 0)),
            scratch_shapes=[pltpu.VMEM((tm, D), jnp.float32)],
            compiler_params=pltpu.CompilerParams(
                dimension_semantics=("parallel", "arbitrary"),
                vmem_limit_bytes=vmem_limit),
        )(x2, w1, b1_2, w2, b2_2, g_2, be_2)

    return out.reshape(orig_shape).astype(orig_dtype)


# ---------------------------------------------------------------------------
# Params / reference / demo
# ---------------------------------------------------------------------------
def init_params(key, input_dim, hidden_dim, output_dim):
    """Deterministic init mimicking nn.Linear / nn.LayerNorm defaults."""
    assert input_dim == output_dim, "residual + LayerNorm require equal dims"
    k1, k2, k3, k4 = jax.random.split(key, 4)
    bound1 = 1.0 / math.sqrt(input_dim)
    bound2 = 1.0 / math.sqrt(hidden_dim)
    # stored transposed relative to PyTorch: (in, out)
    w1 = jax.random.uniform(k1, (input_dim, hidden_dim), jnp.float32,
                            -bound1, bound1)
    b1 = jax.random.uniform(k2, (hidden_dim,), jnp.float32, -bound1, bound1)
    w2 = jax.random.uniform(k3, (hidden_dim, output_dim), jnp.float32,
                            -bound2, bound2)
    b2 = jax.random.uniform(k4, (output_dim,), jnp.float32, -bound2, bound2)
    gamma = jnp.ones((output_dim,), jnp.float32)
    beta = jnp.zeros((output_dim,), jnp.float32)
    return w1, b1, w2, b2, gamma, beta


def _reference(x, w1, b1, w2, b2, gamma, beta):
    """Pure-JAX reference mirroring the PyTorch forward (eval mode)."""
    h = jax.nn.gelu(x @ w1 + b1, approximate=False)
    y = h @ w2 + b2
    y = y + x
    mean = jnp.mean(y, axis=-1, keepdims=True)
    var = jnp.mean((y - mean) ** 2, axis=-1, keepdims=True)
    return (y - mean) / jnp.sqrt(var + _LN_EPS) * gamma + beta


if __name__ == "__main__":
    key = jax.random.PRNGKey(0)
    kx, kp = jax.random.split(key)

    batch, seq = 2, 8
    input_dim, hidden_dim = 128, 256          # lane-dense (multiples of 128)
    output_dim = input_dim                    # required by residual + LayerNorm

    x = jax.random.normal(kx, (batch, seq, input_dim), jnp.float32)
    params = init_params(kp, input_dim, hidden_dim, output_dim)
    ref = _reference(x, *params)

    # 1) Default plan (weights-resident fast path at these sizes), exact f32.
    out = jax.block_until_ready(feed_forward(x, *params))
    assert out.shape == x.shape and out.dtype == x.dtype
    assert jnp.allclose(out, ref, atol=1e-4, rtol=1e-4), (
        float(jnp.max(jnp.abs(out - ref))))

    # 2) Hidden-tiled fallback (forced): exercises serpentine weight index
    #    maps and the f32 accumulator across multiple hidden tiles.
    out_t = jax.block_until_ready(
        feed_forward(x, *params, hidden_tile=128, _force_mode="tiled"))
    assert jnp.allclose(out_t, ref, atol=1e-4, rtol=1e-4), (
        float(jnp.max(jnp.abs(out_t - ref))))

    # 3) Partial tail row block (rows % tm != 0): masked output store path.
    x_odd = jax.random.normal(kx, (2, 5, input_dim), jnp.float32)
    out_odd = jax.block_until_ready(feed_forward(x_odd, *params))
    ref_odd = _reference(x_odd, *params)
    assert jnp.allclose(out_odd, ref_odd, atol=1e-4, rtol=1e-4), (
        float(jnp.max(jnp.abs(out_odd - ref_odd))))

    # 4) bf16 MXU operand path (f32 accumulation) — looser tolerance vs f32.
    out_bf16 = jax.block_until_ready(
        feed_forward(x, *params, compute_dtype=jnp.bfloat16))
    assert out_bf16.shape == x.shape and out_bf16.dtype == x.dtype
    assert jnp.allclose(out_bf16, ref, atol=5e-2, rtol=5e-2), (
        float(jnp.max(jnp.abs(out_bf16 - ref))))

    print("KERNEL_OK")
</pallas_src>

<mosaic_0001>
module attributes {stable_mosaic.version = 11 : i64} {
  func.func @_ffn_kernel_resident(%arg0: i32, %arg1: memref<16x128xf32, #tpu.memory_space<vmem>>, %arg2: memref<128x256xf32, #tpu.memory_space<vmem>>, %arg3: memref<1x256xf32, #tpu.memory_space<vmem>>, %arg4: memref<256x128xf32, #tpu.memory_space<vmem>>, %arg5: memref<1x128xf32, #tpu.memory_space<vmem>>, %arg6: memref<1x128xf32, #tpu.memory_space<vmem>>, %arg7: memref<1x128xf32, #tpu.memory_space<vmem>>, %arg8: memref<16x128xf32, #tpu.memory_space<vmem>>) attributes {dimension_semantics = [#tpu.dimension_semantics<parallel>], iteration_bounds = array<i64: 1>, scalar_prefetch = 0 : i64, scratch_operands = 0 : i64, tpu.core_type = #tpu.core_type<tc>, window_params = [{transform_indices = @transform_0, window_bounds = array<i64: 16, 128>}, {pipeline_mode = #tpu.pipeline_mode<synchronous>, transform_indices = @transform_1, window_bounds = array<i64: 128, 256>}, {pipeline_mode = #tpu.pipeline_mode<synchronous>, transform_indices = @transform_2, window_bounds = array<i64: 1, 256>}, {pipeline_mode = #tpu.pipeline_mode<synchronous>, transform_indices = @transform_3, window_bounds = array<i64: 256, 128>}, {pipeline_mode = #tpu.pipeline_mode<synchronous>, transform_indices = @transform_4, window_bounds = array<i64: 1, 128>}, {pipeline_mode = #tpu.pipeline_mode<synchronous>, transform_indices = @transform_5, window_bounds = array<i64: 1, 128>}, {pipeline_mode = #tpu.pipeline_mode<synchronous>, transform_indices = @transform_6, window_bounds = array<i64: 1, 128>}, {transform_indices = @transform_7, window_bounds = array<i64: 16, 128>}]} {
    %c0 = arith.constant 0 : index
    %c0_0 = arith.constant 0 : index
    %0 = vector.load %arg1[%c0, %c0_0] : memref<16x128xf32, #tpu.memory_space<vmem>>, vector<16x128xf32>
    %c0_1 = arith.constant 0 : index
    %c0_2 = arith.constant 0 : index
    %1 = vector.load %arg2[%c0_1, %c0_2] : memref<128x256xf32, #tpu.memory_space<vmem>>, vector<128x256xf32>
    %cst = arith.constant dense<0.000000e+00> : vector<16x256xf32>
    %2 = tpu.matmul %0, %1, %cst {dimension_numbers = #tpu.dot_dimension_numbers<[1], [0], [0], [1], [0, 0, 1, 1], [], []>} : vector<16x128xf32>, vector<128x256xf32>, vector<16x256xf32> -> vector<16x256xf32>
    %c0_3 = arith.constant 0 : index
    %c0_4 = arith.constant 0 : index
    %3 = vector.load %arg3[%c0_3, %c0_4] : memref<1x256xf32, #tpu.memory_space<vmem>>, vector<1x256xf32>
    %4 = vector.broadcast %3 : vector<1x256xf32> to vector<16x256xf32>
    %5 = arith.addf %2, %4 : vector<16x256xf32>
    %cst_5 = arith.constant 5.000000e-01 : f32
    %6 = vector.broadcast %cst_5 : f32 to vector<16x256xf32>
    %7 = arith.mulf %6, %5 : vector<16x256xf32>
    %cst_6 = arith.constant 0.707106769 : f32
    %8 = vector.broadcast %cst_6 : f32 to vector<16x256xf32>
    %9 = arith.mulf %5, %8 : vector<16x256xf32>
    %10 = math.erf %9 : vector<16x256xf32>
    %cst_7 = arith.constant 1.000000e+00 : f32
    %11 = vector.broadcast %cst_7 : f32 to vector<16x256xf32>
    %12 = arith.addf %11, %10 : vector<16x256xf32>
    %13 = arith.mulf %7, %12 : vector<16x256xf32>
    %c0_8 = arith.constant 0 : index
    %c0_9 = arith.constant 0 : index
    %14 = vector.load %arg4[%c0_8, %c0_9] : memref<256x128xf32, #tpu.memory_space<vmem>>, vector<256x128xf32>
    %cst_10 = arith.constant dense<0.000000e+00> : vector<16x128xf32>
    %15 = tpu.matmul %13, %14, %cst_10 {dimension_numbers = #tpu.dot_dimension_numbers<[1], [0], [0], [1], [0, 0, 1, 1], [], []>} : vector<16x256xf32>, vector<256x128xf32>, vector<16x128xf32> -> vector<16x128xf32>
    %c0_11 = arith.constant 0 : index
    %c0_12 = arith.constant 0 : index
    %16 = vector.load %arg5[%c0_11, %c0_12] : memref<1x128xf32, #tpu.memory_space<vmem>>, vector<1x128xf32>
    %17 = vector.broadcast %16 : vector<1x128xf32> to vector<16x128xf32>
    %18 = arith.addf %15, %17 : vector<16x128xf32>
    %19 = arith.addf %18, %0 : vector<16x128xf32>
    %c0_13 = arith.constant 0 : index
    %c0_14 = arith.constant 0 : index
    %20 = vector.load %arg6[%c0_13, %c0_14] : memref<1x128xf32, #tpu.memory_space<vmem>>, vector<1x128xf32>
    %c0_15 = arith.constant 0 : index
    %c0_16 = arith.constant 0 : index
    %21 = vector.load %arg7[%c0_15, %c0_16] : memref<1x128xf32, #tpu.memory_space<vmem>>, vector<1x128xf32>
    %cst_17 = arith.constant dense<0.000000e+00> : vector<16xf32>
    %22 = vector.multi_reduction <add>, %19, %cst_17 [1] : vector<16x128xf32> to vector<16xf32>
    %23 = vector.shape_cast %22 : vector<16xf32> to vector<16x1xf32>
    %cst_18 = arith.constant 1.280000e+02 : f32
    %24 = vector.broadcast %cst_18 : f32 to vector<16x1xf32>
    %25 = arith.divf %23, %24 : vector<16x1xf32>
    %26 = vector.broadcast %25 : vector<16x1xf32> to vector<16x128xf32>
    %27 = arith.subf %19, %26 : vector<16x128xf32>
    %28 = arith.mulf %27, %27 : vector<16x128xf32>
    %cst_19 = arith.constant dense<0.000000e+00> : vector<16xf32>
    %29 = vector.multi_reduction <add>, %28, %cst_19 [1] : vector<16x128xf32> to vector<16xf32>
    %30 = vector.shape_cast %29 : vector<16xf32> to vector<16x1xf32>
    %cst_20 = arith.constant 1.280000e+02 : f32
    %31 = vector.broadcast %cst_20 : f32 to vector<16x1xf32>
    %32 = arith.divf %30, %31 : vector<16x1xf32>
    %cst_21 = arith.constant 9.99999974E-6 : f32
    %33 = vector.broadcast %cst_21 : f32 to vector<16x1xf32>
    %34 = arith.addf %32, %33 : vector<16x1xf32>
    %35 = math.rsqrt %34 : vector<16x1xf32>
    %36 = vector.broadcast %35 : vector<16x1xf32> to vector<16x128xf32>
    %37 = arith.mulf %27, %36 : vector<16x128xf32>
    %38 = vector.broadcast %20 : vector<1x128xf32> to vector<16x128xf32>
    %39 = arith.mulf %37, %38 : vector<16x128xf32>
    %40 = vector.broadcast %21 : vector<1x128xf32> to vector<16x128xf32>
    %41 = arith.addf %39, %40 : vector<16x128xf32>
    %c0_22 = arith.constant 0 : index
    %c0_23 = arith.constant 0 : index
    %42 = vector.load %arg8[%c0_22, %c0_23] : memref<16x128xf32, #tpu.memory_space<vmem>>, vector<16x128xf32>
    tpu.vector_store %arg8[%c0_22, %c0_23], %41 {strides = array<i32>} : memref<16x128xf32, #tpu.memory_space<vmem>>, vector<16x128xf32>,
    return
  }
  func.func @transform_0(%arg0: i32) -> (i32, i32) {
    %c0_i32 = arith.constant 0 : i32
    %c0_i32_0 = arith.constant 0 : i32
    return %arg0, %c0_i32 : i32, i32
  }
  func.func @transform_1(%arg0: i32) -> (i32, i32) {
    %c0_i32 = arith.constant 0 : i32
    %c0_i32_0 = arith.constant 0 : i32
    %c0_i32_1 = arith.constant 0 : i32
    return %c0_i32, %c0_i32_0 : i32, i32
  }
  func.func @transform_2(%arg0: i32) -> (i32, i32) {
    %c0_i32 = arith.constant 0 : i32
    %c0_i32_0 = arith.constant 0 : i32
    %c0_i32_1 = arith.constant 0 : i32
    return %c0_i32, %c0_i32_0 : i32, i32
  }
  func.func @transform_3(%arg0: i32) -> (i32, i32) {
    %c0_i32 = arith.constant 0 : i32
    %c0_i32_0 = arith.constant 0 : i32
    %c0_i32_1 = arith.constant 0 : i32
    return %c0_i32, %c0_i32_0 : i32, i32
  }
  func.func @transform_4(%arg0: i32) -> (i32, i32) {
    %c0_i32 = arith.constant 0 : i32
    %c0_i32_0 = arith.constant 0 : i32
    %c0_i32_1 = arith.constant 0 : i32
    return %c0_i32, %c0_i32_0 : i32, i32
  }
  func.func @transform_5(%arg0: i32) -> (i32, i32) {
    %c0_i32 = arith.constant 0 : i32
    %c0_i32_0 = arith.constant 0 : i32
    %c0_i32_1 = arith.constant 0 : i32
    return %c0_i32, %c0_i32_0 : i32, i32
  }
  func.func @transform_6(%arg0: i32) -> (i32, i32) {
    %c0_i32 = arith.constant 0 : i32
    %c0_i32_0 = arith.constant 0 : i32
    %c0_i32_1 = arith.constant 0 : i32
    return %c0_i32, %c0_i32_0 : i32, i32
  }
  func.func @transform_7(%arg0: i32) -> (i32, i32) {
    %c0_i32 = arith.constant 0 : i32
    %c0_i32_0 = arith.constant 0 : i32
    return %arg0, %c0_i32 : i32, i32
  }
}

</mosaic_0001>

<bundles_post_ra>
// kernel: tpu_custom_call.1
= control target key start
LH: loop header
LB: loop body
LE: loop exit
PB: predicated region body
PF: predicated region fallthrough
CT: control target
= control target key end

     0   :  { %12 = vsyncpa [#allocation3], 0  ;;  %s628_s0 = inlined_call_operand.hbm [shape: f32[16,128], index: 0, kind: input, shape index: {}]   ;;  %s629_s1 = inlined_call_operand.hbm [shape: f32[128,256], index: 1, kind: input, shape index: {}]   ;;  %s630_s2 = inlined_call_operand.vmem [shape: f32[1,256], index: 2, kind: input, shape index: {}]   ;;  %s631_s3 = inlined_call_operand.hbm [shape: f32[256,128], index: 3, kind: input, shape index: {}]   ;;  %s632_s4 = inlined_call_operand.vmem [shape: f32[1,128], index: 4, kind: input, shape index: {}]   ;;  %s633_s5 = inlined_call_operand.vmem [shape: f32[1,128], index: 5, kind: input, shape index: {}]   ;;  %s634_s6 = inlined_call_operand.vmem [shape: f32[1,128], index: 6, kind: input, shape index: {}]   ;;  %s635_s7 = inlined_call_operand.hbm [shape: f32[16,128], index: 7, kind: output, shape index: {}]  }
   0x1   :  { %13 = vsyncpa [#allocation6], 0 }
   0x2   :  { %14 = vsyncpa [#allocation4], 0  ;;  %s536_s24 = smov [#allocation5]  }
   0x3   :  { %s32_s25 = sshll.u32 %s536_s24, 4  ;;  %s33_s25 = int_to_ptr.vmem [resolvable:$true] %s32_s25 }
   0x4   :  { %s458_s26 = scalar_lea.vmem %s33_s25, 4096  ;;  %p463_p1 = scmp.lt.s32.totalorder %s33_s25, %s33_s25 }
   0x5   :  { %p459_p0 = scmp.ne.s32.totalorder %s33_s25, %s458_s26  ;;  %p464_p2 = scmp.lt.s32.totalorder %s458_s26, %s458_s26 }
   0x7   :  { %p465_p3 = por %p464_p2, %p463_p1 }
   0x9   :  { %p466_p4 = pnand %p465_p3, %p459_p0 }
   0xb   :  { %469 = shalt.err (!%p466_p4)
}
   0xc   :  { %s537_s27 = smov 256   ;;  %s538_s28 = smov 16  }
   0xd   :  { %38 = dma.hbm_to_vmem [thread:$0]  %s629_s1, 4096, %s33_s25, [#allocation6], %s537_s27, %s537_s27, %s538_s28  }
   0xe   :  { %s539_s8 = smov [#allocation2]  }
   0xf   :  { %s20_s9 = sshll.u32 %s539_s8, 4  ;;  %s21_s9 = int_to_ptr.vmem [resolvable:$true] %s20_s9 }
  0x10   :  { %s478_s10 = scalar_lea.vmem %s21_s9, 256  ;;  %p483_p6 = scmp.lt.s32.totalorder %s21_s9, %s21_s9 }
  0x11   :  { %p479_p5 = scmp.ne.s32.totalorder %s21_s9, %s478_s10  ;;  %p484_p7 = scmp.lt.s32.totalorder %s478_s10, %s478_s10 }
  0x13   :  { %p485_p8 = por %p484_p7, %p483_p6 }
  0x15   :  { %p486_p9 = pnand %p485_p8, %p479_p5 }
  0x17   :  { %489 = shalt.err (!%p486_p9)
}
  0x18   :  { %s540_s11 = smov 128   ;;  %s541_s12 = smov 8  }
  0x19   :  { %26 = dma.hbm_to_vmem [thread:$0]  %s628_s0, 256, %s21_s9, [#allocation3], %s540_s11, %s540_s11, %s541_s12  }
  0x1a   :  { %s542_s1 = smov [#allocation7]  }
  0x1b   :  { %s46_s15 = sshll.u32 %s542_s1, 4  ;;  %s47_s15 = int_to_ptr.vmem [resolvable:$true] %s46_s15 }
  0x1c   :  { %s498_s16 = scalar_lea.vmem %s47_s15, 4096  ;;  %p503_p11 = scmp.lt.s32.totalorder %s47_s15, %s47_s15 }
  0x1d   :  { %p499_p10 = scmp.ne.s32.totalorder %s47_s15, %s498_s16  ;;  %p504_p12 = scmp.lt.s32.totalorder %s498_s16, %s498_s16 }
  0x1f   :  { %p505_p13 = por %p504_p12, %p503_p11 }
  0x21   :  { %p506_p0 = pnand %p505_p13, %p499_p10 }
  0x23   :  { %509 = shalt.err (!%p506_p0)
}
  0x24   :  { %52 = dma.hbm_to_vmem [thread:$0]  %s631_s3, 4096, %s47_s15, [#allocation6], %s540_s11, %s540_s11, %s541_s12  }
  0x25   :  { %530 = dma.done.wait [#allocation3], 256  }
  0x26   :  { %531 = vsyncadd [#allocation3], 4294967040 }
  0x27   :  { %532 = dma.done.wait [#allocation6], 8192  }
  0x28   :  { %533 = vsyncadd [#allocation6], 4294959104  ;;  %v543_v0 = vmov 0.0   ;;  %v101_v1 = vld [vmem:[#allocation5 + $0xf8] sm:$0xff]  ;;  %v100_v2 = vld [vmem:[#allocation5 + $0xf0] sm:$0xff]  ;;  %s544_s23 = smov [#allocation8]  }
  0x29   :  { %178 = vmatprep.mubr.f32.mxu0 %v543_v0  ;;  %v99_v3 = vld [vmem:[#allocation5 + $0xe8] sm:$0xff]  ;;  %114 = vmatprep.subr.mxu0 %v101_v1  ;;  %v98_v4 = vld [vmem:[#allocation5 + $0xe0] sm:$0xff]  ;;  %v97_v5 = vld [vmem:[#allocation5 + $0xd8] sm:$0xff]  ;;  %s375_s24 = sshll.u32 %s544_s23, 4  ;;  %s376_s24 = int_to_ptr.vmem [resolvable:$true] %s375_s24 }
  0x2a   :  { %115 = vmatpush1.msra.mxu0 %v100_v2  ;;  %v96_v6 = vld [vmem:[#allocation5 + $0xd0] sm:$0xff]  ;;  %v95_v7 = vld [vmem:[#allocation5 + $0xc8] sm:$0xff]  ;;  %v94_v8 = vld [vmem:[#allocation5 + $0xc0] sm:$0xff]  ;;  %s510_s25 = scalar_lea.vmem %s376_s24, 256  ;;  %p515_p2 = scmp.lt.s32.totalorder %s376_s24, %s376_s24 }
  0x2b   :  { %116 = vmatprep.subr.mxu0 %v99_v3  ;;  %v93_v9 = vld [vmem:[#allocation5 + $0xb8] sm:$0xff]  ;;  %v92_v10 = vld [vmem:[#allocation5 + $0xb0] sm:$0xff]  ;;  %v91_v11 = vld [vmem:[#allocation5 + $0xa8] sm:$0xff]  ;;  %v104_v3 = vlaneseq  ;;  %p511_p1 = scmp.ne.s32.totalorder %s376_s24, %s510_s25  ;;  %p516_p3 = scmp.lt.s32.totalorder %s510_s25, %s510_s25 }
  0x2c   :  { %117 = vmatpush1.msra.mxu0 %v98_v4  ;;  %v90_v12 = vld [vmem:[#allocation5 + $0xa0] sm:$0xff]  ;;  %v89_v13 = vld [vmem:[#allocation5 + $0x98] sm:$0xff]  ;;  %v88_v14 = vld [vmem:[#allocation5 + $0x90] sm:$0xff] }
  0x2d   :  { %118 = vmatprep.subr.mxu0 %v97_v5  ;;  %v242_v15 = vld [vmem:[#allocation7 + $0xf8] sm:$0xff]  ;;  %v87_v17 = vld [vmem:[#allocation5 + $0x88] sm:$0xff]  ;;  %v241_v18 = vld [vmem:[#allocation7 + $0xf0] sm:$0xff]  ;;  %v105_v4 = vshrl.u32 %v104_v3, 7  ;;  %p517_p4 = por %p516_p3, %p515_p2 }
  0x2e   :  { %119 = vmatpush1.msra.mxu0 %v96_v6  ;;  %v226_v16 = vld [vmem:[#allocation7 + $0x78] sm:$0xff]  ;;  %391 = vmatprep.subr.mxu1 %v242_v15  ;;  %v225_v19 = vld [vmem:[#allocation7 + $0x70] sm:$0xff]  ;;  %v86_v20 = vld [vmem:[#allocation5 + $0x80] sm:$0xff] }
  0x2f   :  { %120 = vmatprep.subr.mxu0 %v95_v7  ;;  %392 = vmatpush3.msra.mxu1 %v226_v16  ;;  %v240_v21 = vld [vmem:[#allocation7 + $0xe8] sm:$0xff]  ;;  %v85_v22 = vld [vmem:[#allocation5 + $0x78] sm:$0xff]  ;;  %v84_v24 = vld [vmem:[#allocation5 + $0x70] sm:$0xff]  ;;  %v106_v5 = vsub.s32 0, %v105_v4  ;;  %v110_v7 = vsub.s32 1, %v105_v4  ;;  %p518_p5 = pnand %p517_p4, %p511_p1 }
  0x30   :  { %121 = vmatpush1.msra.mxu0 %v94_v8  ;;  %393 = vmatprep.subr.mxu1 %v241_v18  ;;  %v224_v23 = vld [vmem:[#allocation7 + $0x68] sm:$0xff]  ;;  %v82_v26 = vld [vmem:[#allocation5 + $0x60] sm:$0xff]  ;;  %v81_v27 = vld [vmem:[#allocation5 + $0x58] sm:$0xff] }
  0x31   :  { %122 = vmatprep.subr.mxu0 %v93_v9  ;;  %394 = vmatpush3.msra.mxu1 %v225_v19  ;;  %v83_v25 = vld [vmem:[#allocation5 + $0x68] sm:$0xff]  ;;  %v80_v28 = vld [vmem:[#allocation5 + $0x50] sm:$0xff]  ;;  %v78_v30 = vld [vmem:[#allocation5 + $0x40] sm:$0xff] }
  0x32   :  { %123 = vmatpush1.msra.mxu0 %v92_v10  ;;  %395 = vmatprep.subr.mxu1 %v240_v21  ;;  %v79_v29 = vld [vmem:[#allocation5 + $0x48] sm:$0xff]  ;;  %v77_v31 = vld [vmem:[#allocation5 + $0x38] sm:$0xff]  ;;  %v76_v32 = vld [vmem:[#allocation5 + $0x30] sm:$0xff] }
  0x33   :  { %124 = vmatprep.subr.mxu0 %v91_v11  ;;  %396 = vmatpush3.msra.mxu1 %v224_v23  ;;  %v75_v33 = vld [vmem:[#allocation5 + $0x28] sm:$0xff]  ;;  %v74_v34 = vld [vmem:[#allocation5 + $0x20] sm:$0xff]  ;;  %v73_v35 = vld [vmem:[#allocation5 + $0x18] sm:$0xff] }
  0x34   :  { %125 = vmatpush1.msra.mxu0 %v90_v12  ;;  %v72_v36 = vld [vmem:[#allocation5 + $0x10] sm:$0xff]  ;;  %v71_v37 = vld [vmem:[#allocation5 + $0x8] sm:$0xff]  ;;  %v70_v38 = vld [vmem:[#allocation5] sm:$0xff] }
  0x35   :  { %126 = vmatprep.subr.mxu0 %v89_v13  ;;  %v601_v39 = vld [vmem:[#allocation2] sm:$0xff]  ;;  %v605_v40 = vld [vmem:[#allocation2 + $0x8] sm:$0xff]  ;;  %v239_v41 = vld [vmem:[#allocation7 + $0xe0] sm:$0xff] }
  0x36   :  { %127 = vmatpush1.msra.mxu0 %v88_v14  ;;  %397 = vmatprep.subr.mxu1 %v239_v41  ;;  %v223_v42 = vld [vmem:[#allocation7 + $0x60] sm:$0xff]  ;;  %v238_v43 = vld [vmem:[#allocation7 + $0xd8] sm:$0xff]  ;;  %v237_v45 = vld [vmem:[#allocation7 + $0xd0] sm:$0xff] }
  0x37   :  { %128 = vmatprep.subr.mxu0 %v87_v17  ;;  %398 = vmatpush3.msra.mxu1 %v223_v42  ;;  %v222_v44 = vld [vmem:[#allocation7 + $0x58] sm:$0xff]  ;;  %v221_v46 = vld [vmem:[#allocation7 + $0x50] sm:$0xff]  ;;  %v236_v47 = vld [vmem:[#allocation7 + $0xc8] sm:$0xff] }
  0x38   :  { %129 = vmatpush1.msra.mxu0 %v86_v20  ;;  %399 = vmatprep.subr.mxu1 %v238_v43  ;;  %v220_v48 = vld [vmem:[#allocation7 + $0x48] sm:$0xff]  ;;  %v235_v49 = vld [vmem:[#allocation7 + $0xc0] sm:$0xff]  ;;  %v234_v51 = vld [vmem:[#allocation7 + $0xb8] sm:$0xff] }
  0x39   :  { %130 = vmatprep.subr.mxu0 %v85_v22  ;;  %400 = vmatpush3.msra.mxu1 %v222_v44  ;;  %v219_v50 = vld [vmem:[#allocation7 + $0x40] sm:$0xff]  ;;  %v218_v52 = vld [vmem:[#allocation7 + $0x38] sm:$0xff]  ;;  %v233_v53 = vld [vmem:[#allocation7 + $0xb0] sm:$0xff] }
  0x3a   :  { %131 = vmatpush1.msra.mxu0 %v84_v24  ;;  %401 = vmatprep.subr.mxu1 %v237_v45  ;;  %v217_v54 = vld [vmem:[#allocation7 + $0x30] sm:$0xff]  ;;  %v232_v55 = vld [vmem:[#allocation7 + $0xa8] sm:$0xff]  ;;  %v231_v57 = vld [vmem:[#allocation7 + $0xa0] sm:$0xff] }
  0x3b   :  { %132 = vmatprep.subr.mxu0 %v83_v25  ;;  %402 = vmatpush3.msra.mxu1 %v221_v46  ;;  %v216_v56 = vld [vmem:[#allocation7 + $0x28] sm:$0xff]  ;;  %v215_v58 = vld [vmem:[#allocation7 + $0x20] sm:$0xff]  ;;  %v230_v59 = vld [vmem:[#allocation7 + $0x98] sm:$0xff] }
  0x3c   :  { %133 = vmatpush1.msra.mxu0 %v82_v26  ;;  %403 = vmatprep.subr.mxu1 %v236_v47  ;;  %v214_v60 = vld [vmem:[#allocation7 + $0x18] sm:$0xff]  ;;  %v229_v61 = vld [vmem:[#allocation7 + $0x90] sm:$0xff]  ;;  %v228_v63 = vld [vmem:[#allocation7 + $0x88] sm:$0xff] }
  0x3d   :  { %134 = vmatprep.subr.mxu0 %v81_v27  ;;  %404 = vmatpush3.msra.mxu1 %v220_v48  ;;  %v213_v62 = vld [vmem:[#allocation7 + $0x10] sm:$0xff]  ;;  %v227_v1 = vld [vmem:[#allocation7 + $0x80] sm:$0xff] }
  0x3e   :  { %135 = vmatpush1.msra.mxu0 %v80_v28  ;;  %405 = vmatprep.subr.mxu1 %v235_v49  ;;  %v211_v2 = vld [vmem:[#allocation7] sm:$0xff]  ;;  %v102_v6 = vld [vmem:[%s630_s2] sm:$0x3] }
  0x3f   :  { %136 = vmatprep.subr.mxu0 %v79_v29  ;;  %406 = vmatpush3.msra.mxu1 %v219_v50  ;;  %v107_v8 = vrot.slane %v102_v6, %v106_v5  ;;  %v111_v9 = vrot.slane %v102_v6, %v110_v7  ;;  %v388_v41 = vld [vmem:[%s632_s4] ss:$0 sm:$0xff] }
  0x40   :  { %137 = vmatpush1.msra.mxu0 %v78_v30  ;;  %407 = vmatprep.subr.mxu1 %v234_v51 }
  0x41   :  { %138 = vmatprep.subr.mxu0 %v77_v31  ;;  %408 = vmatpush3.msra.mxu1 %v218_v52 }
  0x42   :  { %139 = vmatpush1.msra.mxu0 %v76_v32  ;;  %409 = vmatprep.subr.mxu1 %v233_v53 }
  0x43   :  { %140 = vmatprep.subr.mxu0 %v75_v33  ;;  %410 = vmatpush3.msra.mxu1 %v217_v54 }
  0x44   :  { %141 = vmatpush1.msra.mxu0 %v74_v34  ;;  %411 = vmatprep.subr.mxu1 %v232_v55 }
  0x45   :  { %142 = vmatprep.subr.mxu0 %v73_v35  ;;  %412 = vmatpush3.msra.mxu1 %v216_v56 }
  0x46   :  { %143 = vmatpush1.msra.mxu0 %v72_v36  ;;  %413 = vmatprep.subr.mxu1 %v231_v57 }
  0x47   :  { %144 = vmatprep.subr.mxu0 %v71_v37  ;;  %414 = vmatpush3.msra.mxu1 %v215_v58 }
  0x48   :  { %145 = vmatpush1.msra.mxu0 %v70_v38  ;;  %415 = vmatprep.subr.mxu1 %v230_v59 }
  0x49   :  { %179 = vmatmul.mubr.f32.vlgmr.msra.gmra.mxu0 %v601_v39  ;;  %416 = vmatpush3.msra.mxu1 %v214_v60 }
  0x4a   :  { %184 = vmatprep.mubr.f32.mxu0 %v543_v0  ;;  %417 = vmatprep.subr.mxu1 %v229_v61  ;;  %v212_v0 = vld [vmem:[#allocation7 + $0x8] sm:$0xff] }
  0x4b   :  { %418 = vmatpush3.msra.mxu1 %v213_v62 }
  0x4c   :  { %419 = vmatprep.subr.mxu1 %v228_v63 }
  0x4d   :  { %185 = vmatmul.mubr.f32.gmra.mxu0 %v605_v40  ;;  %420 = vmatpush3.msra.mxu1 %v212_v0  ;;  %v389_v0 = vld [vmem:[%s633_s5] ss:$0 sm:$0xff] }
  0x4e   :  { %421 = vmatprep.subr.mxu1 %v227_v1 }
  0x4f   :  { %422 = vmatpush3.msra.mxu1 %v211_v2  ;;  %v390_v2 = vld [vmem:[%s634_s6] ss:$0 sm:$0xff] }
 0x109   :  { %v180_v10 = vpop.f32.mrf.mxu0 }
 0x10a   :  { %v181_v11 = vadd.f32 %v180_v10, %v107_v8 }
 0x10b   :  { %v182_v12 = vpop.f32.mrf.mxu0 }
 0x10c   :  { %v195_v13 = vmul.f32 0.70710677, %v181_v11  ;;  %v183_v14 = vadd.f32 %v182_v12, %v111_v9  ;;  %v191_v28 = vmul.f32 0.5, %v181_v11 }
 0x10d   :  { %v186_v15 = vpop.f32.mrf.mxu0 }
 0x10e   :  { %438 = verf.f32 %v195_v13  ;;  %v196_v16 = vmul.f32 0.70710677, %v183_v14  ;;  %v187_v17 = vadd.f32 %v186_v15, %v107_v8  ;;  %v192_v25 = vmul.f32 0.5, %v183_v14 }
 0x10f   :  { %v188_v18 = vpop.f32.mrf.mxu0 }
 0x110   :  { %440 = verf.f32 %v196_v16  ;;  %v197_v19 = vmul.f32 0.70710677, %v187_v17  ;;  %v189_v20 = vadd.f32 %v188_v18, %v111_v9  ;;  %v193_v35 = vmul.f32 0.5, %v187_v17 }
 0x112   :  { %442 = verf.f32 %v197_v19  ;;  %v198_v21 = vmul.f32 0.70710677, %v189_v20  ;;  %v194_v33 = vmul.f32 0.5, %v189_v20 }
 0x114   :  { %444 = verf.f32 %v198_v21 }
 0x11b   :  { %v439_v22 = vpop.eup %438 }
 0x11c   :  { %v203_v24 = vadd.f32 1.0, %v439_v22 }
 0x11d   :  { %v441_v23 = vpop.eup %440 }
 0x11e   :  { %v204_v26 = vadd.f32 1.0, %v441_v23  ;;  %v207_v31 = vmul.f32 %v203_v24, %v191_v28 }
 0x11f   :  { %v443_v27 = vpop.eup %442 }
 0x120   :  { %v208_v29 = vmul.f32 %v204_v26, %v192_v25  ;;  %v205_v32 = vadd.f32 1.0, %v443_v27 }
 0x121   :  { %v445_v30 = vpop.eup %444 }
 0x122   :  { %314 = vmatprep.mubr.f32.mxu1 %v208_v29  ;;  %v206_v34 = vadd.f32 1.0, %v445_v30  ;;  %v209_v37 = vmul.f32 %v205_v32, %v193_v35 }
 0x123   :  { %315 = vmatmul.mubr.f32.vlgmr.msra.gmra.mxu1 %v207_v31 }
 0x124   :  { %v210_v36 = vmul.f32 %v206_v34, %v194_v33 }
 0x126   :  { %319 = vmatprep.mubr.f32.mxu1 %v210_v36 }
 0x127   :  { %320 = vmatmul.mubr.f32.gmra.mxu1 %v209_v37 }
 0x1e3   :  { %v423_v38 = vpop.f32.mrf.mxu1 }
 0x1e5   :  { %v424_v42 = vpop.f32.mrf.mxu1 }
 0x1e6   :  { %v425_v43 = vadd.f32 %v424_v42, %v423_v38 }
 0x1e7   :  { %v426_v44 = vpop.f32.mrf.mxu1 }
 0x1e8   :  { %v317_v45 = vadd.f32 %v425_v43, %v388_v41 }
 0x1e9   :  { %v427_v46 = vpop.f32.mrf.mxu1 }
 0x1ea   :  { %v428_v47 = vadd.f32 %v427_v46, %v426_v44  ;;  %v325_v48 = vadd.f32 %v317_v45, %v601_v39 }
 0x1ec   :  { %v322_v49 = vadd.f32 %v428_v47, %v388_v41  ;;  %329 = vadd.xlane.f32.xlu0 %v325_v48 }
 0x1ee   :  { %v326_v50 = vadd.f32 %v322_v49, %v605_v40 }
 0x1f0   :  { %331 = vadd.xlane.f32.xlu0 %v326_v50 }
 0x275   :  { %v330_v51 = vpop.xlane.xlu0 %329 }
 0x276   :  { %v334_v52 = vmul.f32 0.0078125, %v330_v51 }
 0x278   :  { %v336_v53 = vsub.f32 %v325_v48, %v334_v52 }
 0x279   :  { %v332_v54 = vpop.xlane.xlu0 %331 }
 0x27a   :  { %v335_v55 = vmul.f32 0.0078125, %v332_v54  ;;  %v338_v56 = vmul.f32 %v336_v53, %v336_v53 }
 0x27c   :  { %v337_v57 = vsub.f32 %v326_v50, %v335_v55  ;;  %340 = vadd.xlane.f32.xlu1 %v338_v56 }
 0x27e   :  { %v339_v58 = vmul.f32 %v337_v57, %v337_v57 }
 0x280   :  { %342 = vadd.xlane.f32.xlu1 %v339_v58 }
 0x305   :  { %v341_v59 = vpop.xlane.xlu1 %340 }
 0x306   :  { %v344_v60 = vmul.f32 0.0078125, %v341_v59 }
 0x308   :  { %v346_v61 = vadd.f32 1e-05, %v344_v60 }
 0x309   :  { %v343_v62 = vpop.xlane.xlu1 %342 }
 0x30a   :  { %446 = vrsqrt.f32 %v346_v61  ;;  %v345_v39 = vmul.f32 0.0078125, %v343_v62 }
 0x30c   :  { %v347_v63 = vadd.f32 1e-05, %v345_v39 }
 0x30e   :  { %448 = vrsqrt.f32 %v347_v63 }
 0x317   :  { %v447_v40 = vpop.eup %446 }
 0x318   :  { %v350_v1 = vmul.f32 %v447_v40, %v336_v53 }
 0x31a   :  { %v358_v3 = vmul.f32 %v389_v0, %v350_v1 }
 0x31b   :  { %v449_v4 = vpop.eup %448 }
 0x31c   :  { %v351_v5 = vmul.f32 %v449_v4, %v337_v57  ;;  %v366_v6 = vadd.f32 %v390_v2, %v358_v3 }
 0x31e   :  { %v359_v7 = vmul.f32 %v389_v0, %v351_v5  ;;  %368 = vst [vmem:[#allocation8] sm:$0xff] %v366_v6 }
 0x320   :  { %v367_v8 = vadd.f32 %v390_v2, %v359_v7 }
 0x322   :  { %369 = vst [vmem:[#allocation8 + $0x8] sm:$0xff] %v367_v8 }
 0x323   :  { %521 = shalt.err (!%p518_p5)
}
 0x324   :  { %381 = dma.vmem_to_hbm [thread:$0]  %s376_s24, 256, %s635_s7, [#allocation4], %s540_s11, %s540_s11, %s541_s12  }
 0x325   :  { %534 = dma.done.wait [#allocation4], 256  }
 0x326   :  { %535 = vsyncadd [#allocation4], 4294967040 }
 0x327   :  { %385 = vsyncpa [#allocation3], 1 }
 0x328   :  { %386 = vsyncpa [#allocation6], 1 }
 0x329   :  { %387 = vsyncpa [#allocation4], 1 }

</bundles_post_ra>
